<compile_context>
chip_gen: v7x
topology: tpu7x:2x2x1
jax: 0.10.0
libtpu: 0.0.40
codegen_flags: <defaults>
</compile_context>

<pallas_src>
import jax
import jax.numpy as jnp
from jax.experimental import pallas as pl
from jax.experimental.pallas import tpu as pltpu


def _round_up(x, m):
    return ((x + m - 1) // m) * m


# ----------------------------------------------------------------------------
# Pallas kernel: one batch-tile of the fused 4-layer MLP.
# ----------------------------------------------------------------------------
def dqn_mlp_kernel(x_ref,
                   w1_ref, b1_ref,
                   w2_ref, b2_ref,
                   w3_ref, b3_ref,
                   w4_ref, b4_ref,
                   q_ref):
    # Layer 1: cast x to the weight storage dtype *inside* the kernel (bf16
    # MXU path when params are bf16; no-op for f32) and accumulate in f32.
    h = jnp.dot(x_ref[...].astype(w1_ref.dtype), w1_ref[...],
                preferred_element_type=jnp.float32)
    h = jnp.maximum(h + b1_ref[...].astype(jnp.float32), 0.0)

    # Layers 2-4: keep activations in f32 (avoid re-quantizing activations
    # when params are stored in bf16); upcast the tiny weights to f32.
    def linear(h, w_ref, b_ref):
        y = jnp.dot(h, w_ref[...].astype(jnp.float32),
                    preferred_element_type=jnp.float32)
        return y + b_ref[...].astype(jnp.float32)   # (1, out) row broadcasts

    h = jnp.maximum(linear(h, w2_ref, b2_ref), 0.0)   # Linear(24,16) + ReLU
    h = jnp.maximum(linear(h, w3_ref, b3_ref), 0.0)   # Linear(16,8)  + ReLU
    q = linear(h, w4_ref, b4_ref)                     # Linear(8,num_actions)
    q_ref[...] = q.astype(q_ref.dtype)


# ----------------------------------------------------------------------------
# Tile-size heuristic: amortize per-step overhead, keep >=2 steps for the
# v7x megacore when the batch allows it, and stay well inside scoped VMEM.
# ----------------------------------------------------------------------------
_MAX_TILE_M = 2048   # ~2 KB/row lane-padded -> a few MB double-buffered


def _auto_tile_m(batch):
    batch8 = _round_up(max(int(batch), 1), 8)
    if batch8 <= 8:
        return 8
    if batch8 <= 2 * _MAX_TILE_M:
        # split into ~2 grid steps (megacore on v7x, harmless elsewhere)
        return _round_up(pl.cdiv(batch8, 2), 8)
    return _MAX_TILE_M


# ----------------------------------------------------------------------------
# Wrapper: one fused pallas_call, batch-tiled grid, VMEM-resident weights,
# unpadded lane-narrow output (masked store is cheap; HBM bytes dominate).
# ----------------------------------------------------------------------------
def dqn_forward(x, params, *, tile_m=None, out_dtype=jnp.float32):
    """Fused DQN MLP forward pass.

    x:      (batch, input_dim), any float dtype (cast happens in-kernel)
    params: ((w1,b1),(w2,b2),(w3,b3),(w4,b4)) with w as (in, out), b as (out,)
            in f32 or bf16 storage.  Returns Q of shape (batch, num_actions).
    """
    (w1, b1), (w2, b2), (w3, b3), (w4, b4) = params
    batch, input_dim = x.shape
    num_actions = w4.shape[1]

    # 2D (1, out) biases for free sublane broadcast inside the kernel.
    b1r = b1.reshape(1, -1)
    b2r = b2.reshape(1, -1)
    b3r = b3.reshape(1, -1)
    b4r = b4.reshape(1, -1)

    if tile_m is None:
        tile_m = _auto_tile_m(batch)
    tile_m = max(8, _round_up(int(tile_m), 8))

    grid = (pl.cdiv(batch, tile_m),)   # ragged last tile handled by masking

    const2d = lambda i: (0, 0)         # same block every step -> VMEM-resident
    x_spec = pl.BlockSpec((tile_m, input_dim), lambda i: (i, 0))
    q_spec = pl.BlockSpec((tile_m, num_actions), lambda i: (i, 0))
    param_specs = [
        pl.BlockSpec(w1.shape, const2d), pl.BlockSpec(b1r.shape, const2d),
        pl.BlockSpec(w2.shape, const2d), pl.BlockSpec(b2r.shape, const2d),
        pl.BlockSpec(w3.shape, const2d), pl.BlockSpec(b3r.shape, const2d),
        pl.BlockSpec(w4.shape, const2d), pl.BlockSpec(b4r.shape, const2d),
    ]

    q = pl.pallas_call(
        dqn_mlp_kernel,
        out_shape=jax.ShapeDtypeStruct((batch, num_actions), out_dtype),
        grid=grid,
        in_specs=[x_spec] + param_specs,
        out_specs=q_spec,
        compiler_params=pltpu.CompilerParams(
            dimension_semantics=("parallel",),   # megacore split on v7x
        ),
    )(x, w1, b1r, w2, b2r, w3, b3r, w4, b4r)
    return q


# ----------------------------------------------------------------------------
# Deterministic parameter init mirroring the module: weights use
# kaiming_uniform_(nonlinearity='relu') -> bound = sqrt(6/fan_in); biases keep
# the PyTorch default U(-1/sqrt(fan_in), 1/sqrt(fan_in)).
# ----------------------------------------------------------------------------
def init_linear(key, fan_in, fan_out):
    kw, kb = jax.random.split(key)
    w_bound = jnp.sqrt(6.0 / fan_in)
    w = jax.random.uniform(kw, (fan_in, fan_out), jnp.float32, -w_bound, w_bound)
    b_bound = 1.0 / jnp.sqrt(jnp.float32(fan_in))
    b = jax.random.uniform(kb, (fan_out,), jnp.float32, -b_bound, b_bound)
    return w, b


def init_dqn_params(key, input_dim, num_actions):
    dims = [(input_dim, 24), (24, 16), (16, 8), (8, num_actions)]
    keys = jax.random.split(key, len(dims))
    return tuple(init_linear(k, fi, fo) for k, (fi, fo) in zip(keys, dims))


# ----------------------------------------------------------------------------
# Pure-JAX reference.
# ----------------------------------------------------------------------------
def dqn_forward_ref(x, params):
    h = x.astype(jnp.float32)
    for i, (w, b) in enumerate(params):
        h = h @ w.astype(jnp.float32) + b.astype(jnp.float32)
        if i < len(params) - 1:
            h = jnp.maximum(h, 0.0)
    return h


if __name__ == "__main__":
    key = jax.random.PRNGKey(0)
    k_params, k_x, k_x2 = jax.random.split(key, 3)

    batch = 2
    input_dim = 4       # small state dim (e.g. CartPole-like env)
    num_actions = 3

    params = init_dqn_params(k_params, input_dim, num_actions)
    x = jax.random.normal(k_x, (batch, input_dim), dtype=jnp.float32)

    # --- f32 storage, tiny batch (single grid step, ragged tile) ------------
    q = jax.block_until_ready(dqn_forward(x, params))
    q_ref = dqn_forward_ref(x, params)
    assert q.shape == (batch, num_actions)
    assert jnp.allclose(q, q_ref, atol=1e-5, rtol=1e-5), (q, q_ref)

    # --- f32 storage, larger non-multiple batch (auto tile -> 2 grid steps) -
    x_big = jax.random.normal(k_x2, (1000, input_dim), dtype=jnp.float32)
    q_big = jax.block_until_ready(dqn_forward(x_big, params))
    q_big_ref = dqn_forward_ref(x_big, params)
    assert q_big.shape == (1000, num_actions)
    assert jnp.allclose(q_big, q_big_ref, atol=1e-4, rtol=1e-4)

    # --- explicit small tile (exercises multi-step grid + ragged last tile) -
    q_t = jax.block_until_ready(dqn_forward(x_big, params, tile_m=256))
    assert q_t.shape == (1000, num_actions)
    assert jnp.allclose(q_t, q_big_ref, atol=1e-4, rtol=1e-4)

    # --- bf16 parameter storage (in-kernel input cast, f32 activations) -----
    params_bf16 = tuple((w.astype(jnp.bfloat16), b.astype(jnp.bfloat16))
                        for w, b in params)
    q_bf16 = jax.block_until_ready(dqn_forward(x_big, params_bf16))
    q_bf16_ref = dqn_forward_ref(x_big.astype(jnp.bfloat16), params_bf16)
    assert q_bf16.shape == (1000, num_actions)
    assert jnp.allclose(q_bf16, q_bf16_ref, atol=5e-2, rtol=5e-2)

    print("KERNEL_OK")
</pallas_src>

<mosaic_0001>
module attributes {stable_mosaic.version = 11 : i64} {
  func.func @dqn_mlp_kernel(%arg0: i32, %arg1: memref<8x4xf32, #tpu.memory_space<vmem>>, %arg2: memref<4x24xf32, #tpu.memory_space<vmem>>, %arg3: memref<1x24xf32, #tpu.memory_space<vmem>>, %arg4: memref<24x16xf32, #tpu.memory_space<vmem>>, %arg5: memref<1x16xf32, #tpu.memory_space<vmem>>, %arg6: memref<16x8xf32, #tpu.memory_space<vmem>>, %arg7: memref<1x8xf32, #tpu.memory_space<vmem>>, %arg8: memref<8x3xf32, #tpu.memory_space<vmem>>, %arg9: memref<1x3xf32, #tpu.memory_space<vmem>>, %arg10: memref<8x3xf32, #tpu.memory_space<vmem>>) attributes {dimension_semantics = [#tpu.dimension_semantics<parallel>], iteration_bounds = array<i64: 1>, scalar_prefetch = 0 : i64, scratch_operands = 0 : i64, tpu.core_type = #tpu.core_type<tc>, window_params = [{transform_indices = @transform_0, window_bounds = array<i64: 8, 4>}, {pipeline_mode = #tpu.pipeline_mode<synchronous>, transform_indices = @transform_1, window_bounds = array<i64: 4, 24>}, {pipeline_mode = #tpu.pipeline_mode<synchronous>, transform_indices = @transform_2, window_bounds = array<i64: 1, 24>}, {pipeline_mode = #tpu.pipeline_mode<synchronous>, transform_indices = @transform_3, window_bounds = array<i64: 24, 16>}, {pipeline_mode = #tpu.pipeline_mode<synchronous>, transform_indices = @transform_4, window_bounds = array<i64: 1, 16>}, {pipeline_mode = #tpu.pipeline_mode<synchronous>, transform_indices = @transform_5, window_bounds = array<i64: 16, 8>}, {pipeline_mode = #tpu.pipeline_mode<synchronous>, transform_indices = @transform_6, window_bounds = array<i64: 1, 8>}, {pipeline_mode = #tpu.pipeline_mode<synchronous>, transform_indices = @transform_7, window_bounds = array<i64: 8, 3>}, {pipeline_mode = #tpu.pipeline_mode<synchronous>, transform_indices = @transform_8, window_bounds = array<i64: 1, 3>}, {transform_indices = @transform_9, window_bounds = array<i64: 8, 3>}]} {
    %c0 = arith.constant 0 : index
    %c0_0 = arith.constant 0 : index
    %0 = vector.load %arg1[%c0, %c0_0] : memref<8x4xf32, #tpu.memory_space<vmem>>, vector<8x4xf32>
    %c0_1 = arith.constant 0 : index
    %c0_2 = arith.constant 0 : index
    %1 = vector.load %arg2[%c0_1, %c0_2] : memref<4x24xf32, #tpu.memory_space<vmem>>, vector<4x24xf32>
    %cst = arith.constant dense<0.000000e+00> : vector<8x24xf32>
    %2 = tpu.matmul %0, %1, %cst {dimension_numbers = #tpu.dot_dimension_numbers<[1], [0], [0], [1], [0, 0, 1, 1], [], []>} : vector<8x4xf32>, vector<4x24xf32>, vector<8x24xf32> -> vector<8x24xf32>
    %c0_3 = arith.constant 0 : index
    %c0_4 = arith.constant 0 : index
    %3 = vector.load %arg3[%c0_3, %c0_4] : memref<1x24xf32, #tpu.memory_space<vmem>>, vector<1x24xf32>
    %4 = vector.broadcast %3 : vector<1x24xf32> to vector<8x24xf32>
    %5 = arith.addf %2, %4 : vector<8x24xf32>
    %cst_5 = arith.constant 0.000000e+00 : f32
    %6 = vector.broadcast %cst_5 : f32 to vector<8x24xf32>
    %7 = arith.maximumf %5, %6 : vector<8x24xf32>
    %c0_6 = arith.constant 0 : index
    %c0_7 = arith.constant 0 : index
    %8 = vector.load %arg4[%c0_6, %c0_7] : memref<24x16xf32, #tpu.memory_space<vmem>>, vector<24x16xf32>
    %cst_8 = arith.constant dense<0.000000e+00> : vector<8x16xf32>
    %9 = tpu.matmul %7, %8, %cst_8 {dimension_numbers = #tpu.dot_dimension_numbers<[1], [0], [0], [1], [0, 0, 1, 1], [], []>} : vector<8x24xf32>, vector<24x16xf32>, vector<8x16xf32> -> vector<8x16xf32>
    %c0_9 = arith.constant 0 : index
    %c0_10 = arith.constant 0 : index
    %10 = vector.load %arg5[%c0_9, %c0_10] : memref<1x16xf32, #tpu.memory_space<vmem>>, vector<1x16xf32>
    %11 = vector.broadcast %10 : vector<1x16xf32> to vector<8x16xf32>
    %12 = arith.addf %9, %11 : vector<8x16xf32>
    %cst_11 = arith.constant 0.000000e+00 : f32
    %13 = vector.broadcast %cst_11 : f32 to vector<8x16xf32>
    %14 = arith.maximumf %12, %13 : vector<8x16xf32>
    %c0_12 = arith.constant 0 : index
    %c0_13 = arith.constant 0 : index
    %15 = vector.load %arg6[%c0_12, %c0_13] : memref<16x8xf32, #tpu.memory_space<vmem>>, vector<16x8xf32>
    %cst_14 = arith.constant dense<0.000000e+00> : vector<8x8xf32>
    %16 = tpu.matmul %14, %15, %cst_14 {dimension_numbers = #tpu.dot_dimension_numbers<[1], [0], [0], [1], [0, 0, 1, 1], [], []>} : vector<8x16xf32>, vector<16x8xf32>, vector<8x8xf32> -> vector<8x8xf32>
    %c0_15 = arith.constant 0 : index
    %c0_16 = arith.constant 0 : index
    %17 = vector.load %arg7[%c0_15, %c0_16] : memref<1x8xf32, #tpu.memory_space<vmem>>, vector<1x8xf32>
    %18 = vector.broadcast %17 : vector<1x8xf32> to vector<8x8xf32>
    %19 = arith.addf %16, %18 : vector<8x8xf32>
    %cst_17 = arith.constant 0.000000e+00 : f32
    %20 = vector.broadcast %cst_17 : f32 to vector<8x8xf32>
    %21 = arith.maximumf %19, %20 : vector<8x8xf32>
    %c0_18 = arith.constant 0 : index
    %c0_19 = arith.constant 0 : index
    %22 = vector.load %arg8[%c0_18, %c0_19] : memref<8x3xf32, #tpu.memory_space<vmem>>, vector<8x3xf32>
    %cst_20 = arith.constant dense<0.000000e+00> : vector<8x3xf32>
    %23 = tpu.matmul %21, %22, %cst_20 {dimension_numbers = #tpu.dot_dimension_numbers<[1], [0], [0], [1], [0, 0, 1, 1], [], []>} : vector<8x8xf32>, vector<8x3xf32>, vector<8x3xf32> -> vector<8x3xf32>
    %c0_21 = arith.constant 0 : index
    %c0_22 = arith.constant 0 : index
    %24 = vector.load %arg9[%c0_21, %c0_22] : memref<1x3xf32, #tpu.memory_space<vmem>>, vector<1x3xf32>
    %25 = vector.broadcast %24 : vector<1x3xf32> to vector<8x3xf32>
    %26 = arith.addf %23, %25 : vector<8x3xf32>
    %c0_23 = arith.constant 0 : index
    %c0_24 = arith.constant 0 : index
    %27 = vector.load %arg10[%c0_23, %c0_24] : memref<8x3xf32, #tpu.memory_space<vmem>>, vector<8x3xf32>
    tpu.vector_store %arg10[%c0_23, %c0_24], %26 {strides = array<i32>} : memref<8x3xf32, #tpu.memory_space<vmem>>, vector<8x3xf32>,
    return
  }
  func.func @transform_0(%arg0: i32) -> (i32, i32) {
    %c0_i32 = arith.constant 0 : i32
    %c0_i32_0 = arith.constant 0 : i32
    return %arg0, %c0_i32 : i32, i32
  }
  func.func @transform_1(%arg0: i32) -> (i32, i32) {
    %c0_i32 = arith.constant 0 : i32
    %c0_i32_0 = arith.constant 0 : i32
    %c0_i32_1 = arith.constant 0 : i32
    return %c0_i32, %c0_i32_0 : i32, i32
  }
  func.func @transform_2(%arg0: i32) -> (i32, i32) {
    %c0_i32 = arith.constant 0 : i32
    %c0_i32_0 = arith.constant 0 : i32
    %c0_i32_1 = arith.constant 0 : i32
    return %c0_i32, %c0_i32_0 : i32, i32
  }
  func.func @transform_3(%arg0: i32) -> (i32, i32) {
    %c0_i32 = arith.constant 0 : i32
    %c0_i32_0 = arith.constant 0 : i32
    %c0_i32_1 = arith.constant 0 : i32
    return %c0_i32, %c0_i32_0 : i32, i32
  }
  func.func @transform_4(%arg0: i32) -> (i32, i32) {
    %c0_i32 = arith.constant 0 : i32
    %c0_i32_0 = arith.constant 0 : i32
    %c0_i32_1 = arith.constant 0 : i32
    return %c0_i32, %c0_i32_0 : i32, i32
  }
  func.func @transform_5(%arg0: i32) -> (i32, i32) {
    %c0_i32 = arith.constant 0 : i32
    %c0_i32_0 = arith.constant 0 : i32
    %c0_i32_1 = arith.constant 0 : i32
    return %c0_i32, %c0_i32_0 : i32, i32
  }
  func.func @transform_6(%arg0: i32) -> (i32, i32) {
    %c0_i32 = arith.constant 0 : i32
    %c0_i32_0 = arith.constant 0 : i32
    %c0_i32_1 = arith.constant 0 : i32
    return %c0_i32, %c0_i32_0 : i32, i32
  }
  func.func @transform_7(%arg0: i32) -> (i32, i32) {
    %c0_i32 = arith.constant 0 : i32
    %c0_i32_0 = arith.constant 0 : i32
    %c0_i32_1 = arith.constant 0 : i32
    return %c0_i32, %c0_i32_0 : i32, i32
  }
  func.func @transform_8(%arg0: i32) -> (i32, i32) {
    %c0_i32 = arith.constant 0 : i32
    %c0_i32_0 = arith.constant 0 : i32
    %c0_i32_1 = arith.constant 0 : i32
    return %c0_i32, %c0_i32_0 : i32, i32
  }
  func.func @transform_9(%arg0: i32) -> (i32, i32) {
    %c0_i32 = arith.constant 0 : i32
    %c0_i32_0 = arith.constant 0 : i32
    return %arg0, %c0_i32 : i32, i32
  }
}

</mosaic_0001>

<bundles_post_ra>
// kernel: tpu_custom_call.1
= control target key start
LH: loop header
LB: loop body
LE: loop exit
PB: predicated region body
PF: predicated region fallthrough
CT: control target
= control target key end

     0   :  { %14 = vsyncpa [#allocation3], 0  ;;  %vm46_vm0 = vcmask 1043456   ;;  %v472_v1 = vmov 0.0   ;;  %vm42_vm1 = vcmask 31744   ;;  %vm473_vm2 = vmmov 0   ;;  %s580_s0 = inlined_call_operand.vmem [shape: f32[2,4], index: 0, kind: input, shape index: {}]   ;;  %s581_s1 = inlined_call_operand.vmem [shape: f32[4,24], index: 1, kind: input, shape index: {}]   ;;  %s582_s2 = inlined_call_operand.vmem [shape: f32[1,24], index: 2, kind: input, shape index: {}]   ;;  %s583_s3 = inlined_call_operand.vmem [shape: f32[24,16], index: 3, kind: input, shape index: {}]   ;;  %s584_s4 = inlined_call_operand.vmem [shape: f32[1,16], index: 4, kind: input, shape index: {}]   ;;  %s585_s5 = inlined_call_operand.vmem [shape: f32[16,8], index: 5, kind: input, shape index: {}]   ;;  %s586_s6 = inlined_call_operand.vmem [shape: f32[1,8], index: 6, kind: input, shape index: {}]   ;;  %s587_s7 = inlined_call_operand.vmem [shape: f32[8,3], index: 7, kind: input, shape index: {}]   ;;  %s588_s8 = inlined_call_operand.vmem [shape: f32[1,3], index: 8, kind: input, shape index: {}]   ;;  %s589_s9 = inlined_call_operand.hbm [shape: f32[2,3], index: 9, kind: output, shape index: {}]  }
   0x1   :  { %v34_v0 = vld [vmem:[%s581_s1] sm:$0xf]  ;;  %410 = vmatprep.subr.mxu1 %v472_v1  ;;  %v122_v4 = vld [vmem:[%s583_s3 + $0x8] sm:$0xff]  ;;  %412 = vmatprep.mubr.msk.f32.mxu1 %vm473_vm2, %v472_v1  ;;  %v474_v6 = vmov 0.0|0.0   ;;  %v123_v7 = vld [vmem:[%s583_s3 + $0x10] sm:$0xff]  ;;  %vm131_vm3 = vcmask 195584  }
   0x2   :  { %v33_v2 = vld [vmem:[%s580_s0] sm:$0xff]  ;;  %411 = vmatpush3.msk.msra.mxu1 %vm46_vm0, %v34_v0  ;;  %439 = vmatprep.subr.bf16.mxu0 %v474_v6  ;;  %v207_v14 = vld [vmem:[%s585_s5 + $0x8] sm:$0xff]  ;;  %vm215_vm4 = vcmask 130048   ;;  %vm298_vm5 = vcmask 64512   ;;  %vm372_vm6 = vcmask 23552  }
   0x3   :  { %v121_v3 = vld [vmem:[%s583_s3] sm:$0xff]  ;;  %413 = vmatmul.mubr.msk.f32.vlgmr.msra.gmra.mrb[0].mxu1 %vm42_vm1, %v33_v2  ;;  %436 = vmatprep.subr.bf16.mxu1 %v474_v6 }
   0x4   :  { %v437_v5 = vpack.c.bf16 %v122_v4, %v121_v3  ;;  %421 = vmatprep.mubr.msk.f32.mxu1 %vm473_vm2, %v472_v1  ;;  %428 = vmatprep.mubr.msk.f32.mxu0 %vm473_vm2, %v472_v1  ;;  %v390_v8 = vld [vmem:[%s582_s2] ss:$0 sm:$0xff] }
   0x5   :  { %v206_v13 = vld [vmem:[%s585_s5] sm:$0xff] }
   0x6   :  { %438 = vmatpush3.bf16.msra.mxu1 %v437_v5  ;;  %v440_v15 = vpack.c.bf16 %v207_v14, %v206_v13  ;;  %v393_v16 = vld [vmem:[%s584_s4] ss:$0 sm:$0xff] }
   0x7   :  { %419 = vmatprep.subr.mxu1 %v472_v1  ;;  %v290_v21 = vld [vmem:[%s587_s7] sm:$0xff] }
   0x8   :  { %441 = vmatpush3.bf16.msra.mxu0 %v440_v15  ;;  %v395_v22 = vld [vmem:[%s586_s6] ss:$0 sm:$0xff] }
   0x9   :  { %431 = vmatprep.subr.mxu0 %v472_v1  ;;  %v397_v27 = vld [vmem:[%s588_s8] ss:$0 sm:$0xff] }
   0xa   :  { %420 = vmatpush3.msra.mxu1 %v123_v7 }
  0xd6   :  { %v116_v9 = vpop.f32.mrb[0].mxu1 }
  0xd7   :  { %v117_v10 = vadd.f32 %v390_v8, %v116_v9  ;;  %v414_v11 = vpop.f32.mrb[1].mxu1 }
  0xd9   :  { %v120_v12 = vmax.f32 %v117_v10, 0.0 }
  0xdb   :  { %422 = vmatmul.mubr.msk.f32.vlgmr.msra.gmra.mrb[2].mxu1 %vm131_vm3, %v120_v12 }
 0x1ae   :  { %v201_v17 = vpop.f32.mrb[2].mxu1 }
 0x1af   :  { %v202_v18 = vadd.f32 %v393_v16, %v201_v17  ;;  %v423_v19 = vpop.f32.mrb[3].mxu1 }
 0x1b1   :  { %v205_v20 = vmax.f32 %v202_v18, 0.0 }
 0x1b3   :  { %429 = vmatmul.mubr.msk.f32.vlgmr.msra.gmra.mrb[0].mxu0 %vm215_vm4, %v205_v20 }
 0x1b4   :  { %433 = vmatprep.mubr.msk.f32.mxu0 %vm473_vm2, %v472_v1  ;;  %432 = vmatpush3.msra.mxu0 %v290_v21 }
 0x286   :  { %v285_v23 = vpop.f32.mrb[0].mxu0 }
 0x287   :  { %v286_v24 = vadd.f32 %v395_v22, %v285_v23  ;;  %v430_v25 = vpop.f32.mrb[1].mxu0 }
 0x289   :  { %v289_v26 = vmax.f32 %v286_v24, 0.0 }
 0x28b   :  { %434 = vmatmul.mubr.msk.f32.vlgmr.msra.gmra.mrb[2].mxu0 %vm298_vm5, %v289_v26 }
 0x35e   :  { %v368_v28 = vpop.f32.mrb[2].mxu0 }
 0x35f   :  { %v369_v29 = vadd.f32 %v397_v27, %v368_v28  ;;  %v435_v30 = vpop.f32.mrb[3].mxu0 }
 0x361   :  { %373 = vst.msk [vmem:[#allocation2] sm:$0xff] %vm372_vm6, %v369_v29 }
 0x362   :  { %378 = vsyncadd [#allocation3], 96  ;;  %s475_s7 = smov [#allocation2]  }
 0x363   :  { %s379_s27 = sshll.u32 %s475_s7, 4  ;;  %s380_s27 = int_to_ptr.vmem [resolvable:$true] %s379_s27 }
 0x364   :  { %s448_s6 = scalar_lea.vmem %s380_s27, 32  ;;  %s452_s28 = scalar_lea.vmem %s380_s27, 128 }
 0x365   :  { %p449_p0 = scmp.ne.s32.totalorder %s380_s27, %s448_s6  ;;  %p453_p1 = scmp.lt.s32.totalorder %s380_s27, %s380_s27 }
 0x366   :  { %p454_p2 = scmp.lt.s32.totalorder %s452_s28, %s448_s6 }
 0x368   :  { %p455_p3 = por %p454_p2, %p453_p1 }
 0x36a   :  { %p456_p4 = pnand %p455_p3, %p449_p0 }
 0x36c   :  { %459 = shalt.err (!%p456_p4)
}
 0x36d   :  { %s460_s8 = scalar_lea.hbm %s589_s9, 32 }
 0x36e   :  { %p461_p5 = scmp.ne.s32.totalorder %s589_s9, %s460_s8  ;;  %p464_p6 = scmp.lt.u32.totalorder %s460_s8, %s589_s9 }
 0x370   :  { %p466_p7 = pnand %p464_p6, %p461_p5 }
 0x372   :  { %469 = shalt.err (!%p466_p7)
}
 0x373   :  { %s476_s14 = smov 32   ;;  %s477_s15 = smov 2  }
 0x374   :  { %385 = dma.vmem_to_hbm [thread:$0]  %s380_s27, 32, %s589_s9, [#allocation3], %s476_s14, %s476_s14, %s477_s15  }
 0x375   :  { %470 = dma.done.wait [#allocation3], 128  }
 0x376   :  { %471 = vsyncadd [#allocation3], 4294967168 }
 0x377   :  { %389 = vsyncpa [#allocation3], 1 }

</bundles_post_ra>
